<compile_context>
chip_gen: v7x
topology: tpu7x:2x2x1
jax: 0.10.0
libtpu: 0.0.40
codegen_flags: <defaults>
</compile_context>

<pallas_src>
import jax
import jax.numpy as jnp
from jax.experimental import pallas as pl
from jax.experimental.pallas import tpu as pltpu


def _round_up(x: int, m: int) -> int:
    return ((x + m - 1) // m) * m


def _sublane(dtype) -> int:
    """Second-to-last-dim tile unit: 8 (4-byte), 16 (2-byte), 32 (1-byte)."""
    return max(8, 32 // max(1, jnp.dtype(dtype).itemsize))


def _vmem_capacity_bytes() -> int:
    """Physical VMEM of this TPU generation (fallback: v7x's 64 MiB)."""
    try:
        cap = getattr(pltpu.get_tpu_info(), "vmem_capacity_bytes", None)
        if cap:
            return int(cap)
    except Exception:
        pass
    return 64 << 20


def edge_encoder_kernel(x_row_ref, x_col_ref, o_ref):
    # x_row_ref: (TB, 1, NJ)  row view of x (sigmoid operand), lane-major.
    # x_col_ref: (TB, TM, 1)  column view of x, already in sublane layout.
    # o_ref:     (TB, TM, NJ) output block; NJ is a multiple of 128, so the
    #                         store below is a full-width, unmasked vst.
    s = jax.nn.sigmoid(x_row_ref[...].astype(jnp.float32))     # EUP exp
    col = x_col_ref[...].astype(jnp.float32)                   # (TB, TM, 1)
    # out[b, i, j] = x[b, i] * sigmoid(x[b, j]) -- pure VPU broadcast-multiply.
    o_ref[...] = (col * s).astype(o_ref.dtype)


def edge_encoder(x, *, tile_bytes=None):
    """x: (B, N) -> (B, N, N) with out[b, i, j] = x[b, i] * sigmoid(x[b, j])."""
    B, N = x.shape
    dtype = x.dtype
    elem = jnp.dtype(dtype).itemsize
    sub = _sublane(dtype)

    # Lane-dense block width for the j axis (the array stays (B, N, N); Pallas
    # drops out-of-bounds columns on writeback, so write volume stays exact).
    NJ = _round_up(N, 128)

    # ---- generation-aware budgets ------------------------------------------
    vmem_cap = _vmem_capacity_bytes()
    usable = min((vmem_cap * 7) // 10, 96 << 20)  # ~45 MiB on v7x, ~90 MiB on v5e/v6e
    if tile_bytes is None:
        # v7x: only 64 MiB VMEM but ~2.3x v6e HBM BW -> larger blocks keep the
        # ~0.35us/step overhead <10% of a block's writeback time.
        # v5e/v6e: 8 MiB blocks are already >=85% of the write roofline.
        tile_bytes = (12 << 20) if vmem_cap <= (64 << 20) else (8 << 20)

    # Cap the output block so double-buffered {output + lane-padded column
    # block + row block + headroom} fits under `usable`.  The (TB, TM, 1)
    # column block really occupies TB*TM*128*elem in VMEM.
    tile_eff = min(int(tile_bytes),
                   ((usable - (4 << 20)) * NJ) // (2 * (NJ + 128)))
    tile_eff = max(tile_eff, 1 << 20)

    # ---- tile sizes (cdiv grid: no divisibility requirements on B or N) ----
    rows_cap = max(sub, ((tile_eff // (NJ * elem)) // sub) * sub)
    TM = min(_round_up(N, sub), rows_cap)               # rows per step
    TB = max(1, min(B, tile_eff // (TM * NJ * elem)))   # batch elems per step

    # Guarantee >= 2 grid steps along a "parallel" axis so both v7x
    # TensorCores get write work (regardless of B's parity).
    if pl.cdiv(B, TB) * pl.cdiv(N, TM) < 2:
        if N > sub:
            TM = max(sub, pl.cdiv(N, 2 * sub) * sub)
        elif B >= 2:
            TB = pl.cdiv(B, 2)

    grid = (pl.cdiv(B, TB), pl.cdiv(N, TM))

    # ---- VMEM accounting (double-buffered, incl. lane/sublane padding) -----
    out_buf = TB * TM * NJ * elem
    col_buf = TB * TM * 128 * elem      # (TB, TM, 1): last dim pads to 128 lanes
    row_buf = TB * sub * NJ * elem      # (TB, 1, NJ): middle dim pads to `sub`
    needed = 2 * (out_buf + col_buf + row_buf) + (2 << 20)
    vmem_limit = int(max(needed, 16 << 20))

    cost = pl.CostEstimate(
        flops=B * N * N,
        transcendentals=B * N * grid[1],   # sigmoid recomputed per row tile
        bytes_accessed=elem * (B * N * N + 2 * B * N),
    )

    return pl.pallas_call(
        edge_encoder_kernel,
        out_shape=jax.ShapeDtypeStruct((B, N, N), dtype),
        grid_spec=pl.GridSpec(
            grid=grid,
            in_specs=[
                # Row operand: stays resident across the row-tile axis.
                pl.BlockSpec((TB, 1, NJ), lambda b, m: (b, 0, 0)),
                # Column operand: sublane layout via a tiny strided DMA.
                pl.BlockSpec((TB, TM, 1), lambda b, m: (b, m, 0)),
            ],
            out_specs=pl.BlockSpec((TB, TM, NJ), lambda b, m: (b, m, 0)),
        ),
        compiler_params=pltpu.CompilerParams(
            dimension_semantics=("parallel", "parallel"),
            vmem_limit_bytes=vmem_limit,
        ),
        cost_estimate=cost,
    )(x[:, None, :], x[:, :, None])


if __name__ == "__main__":
    key = jax.random.PRNGKey(0)
    k0, k1 = jax.random.split(key)

    # Primary small test (lane-aligned N).
    B, N = 2, 128
    x = jax.random.normal(k0, (B, N), dtype=jnp.float32)
    out = jax.block_until_ready(edge_encoder(x))
    ref = x[:, :, None] * jax.nn.sigmoid(x)[:, None, :]
    assert out.shape == (B, N, N)
    assert jnp.allclose(out, ref, atol=1e-5, rtol=1e-5)

    # Ragged shapes: exercise the cdiv grid and the padded (lane-dense) blocks.
    B2, N2 = 3, 100
    x2 = jax.random.normal(k1, (B2, N2), dtype=jnp.float32)
    out2 = jax.block_until_ready(edge_encoder(x2))
    ref2 = x2[:, :, None] * jax.nn.sigmoid(x2)[:, None, :]
    assert out2.shape == (B2, N2, N2)
    assert jnp.allclose(out2, ref2, atol=1e-5, rtol=1e-5)

    print("KERNEL_OK")
</pallas_src>

<mosaic_0001>
module attributes {stable_mosaic.version = 11 : i64} {
  func.func @edge_encoder_kernel(%arg0: i32, %arg1: i32, %arg2: memref<2x1x128xf32, #tpu.memory_space<vmem>>, %arg3: memref<2x64x1xf32, #tpu.memory_space<vmem>>, %arg4: memref<2x64x128xf32, #tpu.memory_space<vmem>>) attributes {dimension_semantics = [#tpu.dimension_semantics<parallel>, #tpu.dimension_semantics<parallel>], iteration_bounds = array<i64: 1, 2>, scalar_prefetch = 0 : i64, scratch_operands = 0 : i64, tpu.core_type = #tpu.core_type<tc>, window_params = [{transform_indices = @transform_0, window_bounds = array<i64: 2, 1, 128>}, {transform_indices = @transform_1, window_bounds = array<i64: 2, 64, 1>}, {transform_indices = @transform_2, window_bounds = array<i64: 2, 64, 128>}]} {
    %c0 = arith.constant 0 : index
    %c0_0 = arith.constant 0 : index
    %c0_1 = arith.constant 0 : index
    %0 = vector.load %arg2[%c0, %c0_0, %c0_1] : memref<2x1x128xf32, #tpu.memory_space<vmem>>, vector<2x1x128xf32>
    %1 = arith.negf %0 : vector<2x1x128xf32>
    %2 = math.exp %1 : vector<2x1x128xf32>
    %cst = arith.constant 1.000000e+00 : f32
    %3 = vector.broadcast %cst : f32 to vector<2x1x128xf32>
    %4 = arith.addf %3, %2 : vector<2x1x128xf32>
    %5 = arith.divf %3, %4 : vector<2x1x128xf32>
    %c0_2 = arith.constant 0 : index
    %c0_3 = arith.constant 0 : index
    %c0_4 = arith.constant 0 : index
    %6 = vector.load %arg3[%c0_2, %c0_3, %c0_4] : memref<2x64x1xf32, #tpu.memory_space<vmem>>, vector<2x64x1xf32>
    %7 = vector.broadcast %6 : vector<2x64x1xf32> to vector<2x64x128xf32>
    %8 = vector.broadcast %5 : vector<2x1x128xf32> to vector<2x64x128xf32>
    %9 = arith.mulf %7, %8 : vector<2x64x128xf32>
    %c0_5 = arith.constant 0 : index
    %c0_6 = arith.constant 0 : index
    %c0_7 = arith.constant 0 : index
    %10 = vector.load %arg4[%c0_5, %c0_6, %c0_7] : memref<2x64x128xf32, #tpu.memory_space<vmem>>, vector<2x64x128xf32>
    tpu.vector_store %arg4[%c0_5, %c0_6, %c0_7], %9 {strides = array<i32>} : memref<2x64x128xf32, #tpu.memory_space<vmem>>, vector<2x64x128xf32>,
    return
  }
  func.func @transform_0(%arg0: i32, %arg1: i32) -> (i32, i32, i32) {
    %c0_i32 = arith.constant 0 : i32
    %c0_i32_0 = arith.constant 0 : i32
    %c0_i32_1 = arith.constant 0 : i32
    return %arg0, %c0_i32, %c0_i32_0 : i32, i32, i32
  }
  func.func @transform_1(%arg0: i32, %arg1: i32) -> (i32, i32, i32) {
    %c0_i32 = arith.constant 0 : i32
    %c0_i32_0 = arith.constant 0 : i32
    return %arg0, %arg1, %c0_i32 : i32, i32, i32
  }
  func.func @transform_2(%arg0: i32, %arg1: i32) -> (i32, i32, i32) {
    %c0_i32 = arith.constant 0 : i32
    %c0_i32_0 = arith.constant 0 : i32
    return %arg0, %arg1, %c0_i32 : i32, i32, i32
  }
}

</mosaic_0001>

<bundles_post_ra>
// kernel: tpu_custom_call.1
= control target key start
LH: loop header
LB: loop body
LE: loop exit
PB: predicated region body
PF: predicated region fallthrough
CT: control target
= control target key end

     0   :  { %7 = vsyncpa [#allocation4], 0  ;;  %s902_s0 = inlined_call_operand.vmem [shape: f32[2,1,128], index: 0, kind: input, shape index: {}]   ;;  %s903_s1 = inlined_call_operand.vmem [shape: f32[2,128,1], index: 1, kind: input, shape index: {}]   ;;  %s904_s2 = inlined_call_operand.hbm [shape: f32[2,128,128], index: 2, kind: output, shape index: {}]  }
   0x1   :  { %9 = vsyncpa [#allocation4 + $0x1], 0  ;;  %s745_s9 = smov 0   ;;  %s747_s10 = smov 0  }
   0x2   :  { %s749_s11 = smov 0   ;;  %s751_s12 = smov 0  }
   0x3   :  { %s753_s13 = smov 0   ;;  %s755_s14 = smov 0  }
   0x4 LB: > { %s573_s15 = sadd.s32 4294967295, %s721_s14   ;;  %s574_s16 = sadd.s32 4294967294, %s721_s14   ;;  %s721_s14 = sphi %s755_s14, %s15_s14   ;;  %s717_s13 = sphi %s753_s13, %s911_s13   ;;  %s713_s12 = sphi %s751_s12, %s910_s12   ;;  %s709_s11 = sphi %s749_s11, %s909_s11   ;;  %s705_s10 = sphi %s747_s10, %s908_s10   ;;  %s701_s9 = sphi %s745_s9, %s907_s9  }
   0x5   : > { %s24_s17 = sadd.s32 1, %s717_s13  ;;  %s62_s18 = sadd.s32 1, %s709_s11 }
   0x6   : > { %p25_p0 = scmp.ge.s32.totalorder %s24_s17, 2  ;;  %p69_p1 = scmp.ne.s32.totalorder %s709_s11, %s705_s10 }
   0x7   : > { %p70_p2 = scmp.eq.s32.totalorder %s721_s14, 0  ;;  %p101_p3 = scmp.eq.s32.totalorder %s573_s15, 1 }
   0x8   : > { %s913_s17 = smov (%p25_p0, %s24_s17), 0  ;;  %p106_p6 = scmp.ne.s32.totalorder %s705_s10, %s701_s9 }
   0x9   : > { %p71_p4 = por %p70_p2, %p69_p1  ;;  %p784_p5 = por %p101_p3, %p69_p1 }
   0xa   : > { %s58_s20 = ssub.s32 %s717_s13, %s913_s17  ;;  %p107_p8 = scmp.eq.s32.totalorder %s574_s16, 1 }
   0xb   : > { %p60_p7 = scmp.eq.s32.totalorder %s58_s20, 0  ;;  %p577_p10 = scmp.ge.s32.totalorder %s721_s14, 2 }
   0xc   : > { %p795_p9 = por %p107_p8, %p106_p6 }
   0xd   : > { %s793_s21 = scalar_select %p60_p7, %s709_s11, %s62_s18  }
   0xe   : > { %131 = sbr.rel (%p577_p10) target bundleno = 33 (0x21), region = 20 }
  0x15   : > { %134 = sbr.rel (!%p71_p4) target bundleno = 33 (0x21), region = 24  ;;  %s136_s23 = sand.u32 (%p71_p4), 1, %s709_s11  }
  0x16   : > { %s591_s24 = sshll.u32 (%p71_p4), %s717_s13, 6  ;;  %s578_s25 = sshll.u32 (%p71_p4), %s136_s23, 7 }
  0x17   : > { %s807_s28 = scalar_lea.vmem (%p71_p4), %s903_s1, %s591_s24  ;;  %s138_s29 = scalar_lea.vmem (%p71_p4), [#allocation2], %s578_s25 }
  0x18   : > { %v202_v0 = vld [vmem:[%s807_s28] sm:$0xff] (%p71_p4)  ;;  %v204_v1 = vld [vmem:[%s807_s28 + $0x8] sm:$0xff] (%p71_p4)  ;;  %v206_v2 = vld [vmem:[%s807_s28 + $0x10] sm:$0xff] (%p71_p4) }
  0x19   : > { %203 = vst [vmem:[%s138_s29] sm:$0xff] (%p71_p4), %v202_v0  ;;  %205 = vst [vmem:[%s138_s29 + $0x8] sm:$0xff] (%p71_p4), %v204_v1  ;;  %v208_v3 = vld [vmem:[%s807_s28 + $0x18] sm:$0xff] (%p71_p4)  ;;  %v210_v4 = vld [vmem:[%s807_s28 + $0x20] sm:$0xff] (%p71_p4) }
  0x1a   : > { %207 = vst [vmem:[%s138_s29 + $0x10] sm:$0xff] (%p71_p4), %v206_v2  ;;  %v212_v5 = vld [vmem:[%s807_s28 + $0x28] sm:$0xff] (%p71_p4)  ;;  %209 = vst [vmem:[%s138_s29 + $0x18] sm:$0xff] (%p71_p4), %v208_v3  ;;  %v214_v6 = vld [vmem:[%s807_s28 + $0x30] sm:$0xff] (%p71_p4) }
  0x1b   : > { %211 = vst [vmem:[%s138_s29 + $0x20] sm:$0xff] (%p71_p4), %v210_v4  ;;  %213 = vst [vmem:[%s138_s29 + $0x28] sm:$0xff] (%p71_p4), %v212_v5  ;;  %v216_v7 = vld [vmem:[%s807_s28 + $0x38] sm:$0xff] (%p71_p4)  ;;  %v218_v8 = vld [vmem:[%s807_s28 + $0x80] sm:$0xff] (%p71_p4) }
  0x1c   : > { %215 = vst [vmem:[%s138_s29 + $0x30] sm:$0xff] %v214_v6  ;;  %217 = vst [vmem:[%s138_s29 + $0x38] sm:$0xff] %v216_v7  ;;  %v220_v9 = vld [vmem:[%s807_s28 + $0x88] sm:$0xff]  ;;  %v222_v10 = vld [vmem:[%s807_s28 + $0x90] sm:$0xff] }
  0x1d   : > { %219 = vst [vmem:[%s138_s29 + $0x40] sm:$0xff] %v218_v8  ;;  %v224_v11 = vld [vmem:[%s807_s28 + $0x98] sm:$0xff]  ;;  %221 = vst [vmem:[%s138_s29 + $0x48] sm:$0xff] %v220_v9  ;;  %v226_v12 = vld [vmem:[%s807_s28 + $0xa0] sm:$0xff] }
  0x1e   : > { %223 = vst [vmem:[%s138_s29 + $0x50] sm:$0xff] %v222_v10  ;;  %225 = vst [vmem:[%s138_s29 + $0x58] sm:$0xff] %v224_v11  ;;  %v228_v13 = vld [vmem:[%s807_s28 + $0xa8] sm:$0xff]  ;;  %v230_v14 = vld [vmem:[%s807_s28 + $0xb0] sm:$0xff] }
  0x1f   : > { %227 = vst [vmem:[%s138_s29 + $0x60] sm:$0xff] %v226_v12  ;;  %229 = vst [vmem:[%s138_s29 + $0x68] sm:$0xff] %v228_v13  ;;  %v232_v15 = vld [vmem:[%s807_s28 + $0xb8] sm:$0xff] }
  0x20   : > { %231 = vst [vmem:[%s138_s29 + $0x70] sm:$0xff] %v230_v14  ;;  %233 = vst [vmem:[%s138_s29 + $0x78] sm:$0xff] %v232_v15 }
  0x21 PF: > { %p581_p11 = scmp.ge.s32.totalorder %s721_s14, 1  ;;  %p238_p12 = scmp.lt.s32.totalorder %s721_s14, 3 }
  0x23   : > { %p239_p13 = pnand %p581_p11, %p238_p12 }
  0x24   : > { %s245_s30 = sand.u32 (!%p239_p13), 1, %s705_s10   ;;  %v723_v16 = vmov (!%p239_p13), 0   ;;  %v279_v33 = vld [vmem:[%s902_s0] sm:$0x1] (!%p239_p13)  ;;  %v280_v35 = vld [vmem:[%s902_s0 + $0x1] sm:$0x1] (!%p239_p13)  ;;  %v391_v39 = vlaneseq (!%p239_p13) }
  0x25   : > { %242 = sbr.rel (%p239_p13) target bundleno = 208 (0xd0), region = 62  ;;  %662 = vset.pattern.permute.xlu1 (!%p239_p13), %v723_v16  ;;  %661 = vset.pattern.permute.xlu0 (!%p239_p13), %v723_v16  ;;  %s830_s3 = sshll.u32 (!%p239_p13), %s245_s30, 7  ;;  %v584_v34 = vmul.f32 (!%p239_p13), -1.442695, %v279_v33  ;;  %v585_v37 = vmul.f32 (!%p239_p13), -1.442695, %v280_v35 }
  0x26   : > { %s247_s4 = scalar_lea.vmem (!%p239_p13), [#allocation2], %s830_s3  ;;  %v392_v40 = vshrl.u32 (!%p239_p13), %v391_v39, 7  ;;  %s840_s15 = scalar_lea.vmem (!%p239_p13), [#allocation3], %s830_s3 }
  0x27   : > { %v295_v17 = vld [vmem:[%s247_s4 + $0x10] sm:$0xff] (!%p239_p13)  ;;  %v293_v18 = vld [vmem:[%s247_s4] sm:$0xff] (!%p239_p13)  ;;  %v296_v19 = vld [vmem:[%s247_s4 + $0x18] sm:$0xff] (!%p239_p13)  ;;  %663 = vpow2.f32 (!%p239_p13), %v584_v34  ;;  %s434_s16 = scalar_lea.sflag (!%p239_p13), [#allocation4], %s245_s30 }
  0x28   : > { %321 = vperm.xlu1 (!%p239_p13), %662, %v295_v17   ;;  %311 = vperm.xlu0 (!%p239_p13), %661, %v293_v18   ;;  %v294_v20 = vld [vmem:[%s247_s4 + $0x8] sm:$0xff] (!%p239_p13)  ;;  %v297_v22 = vld [vmem:[%s247_s4 + $0x20] sm:$0xff] (!%p239_p13)  ;;  %v300_v23 = vld [vmem:[%s247_s4 + $0x38] sm:$0xff] (!%p239_p13)  ;;  %665 = vpow2.f32 (!%p239_p13), %v585_v37  ;;  %v393_v42 = vsub.s32 (!%p239_p13), 0, %v392_v40 }
  0x29   : > { %v298_v21 = vld [vmem:[%s247_s4 + $0x28] sm:$0xff] (!%p239_p13)  ;;  %v299_v24 = vld [vmem:[%s247_s4 + $0x30] sm:$0xff] (!%p239_p13)  ;;  %v301_v26 = vld [vmem:[%s247_s4 + $0x40] sm:$0xff] (!%p239_p13) }
  0x2a   : > { %v302_v25 = vld [vmem:[%s247_s4 + $0x48] sm:$0xff] (!%p239_p13)  ;;  %v304_v27 = vld [vmem:[%s247_s4 + $0x58] sm:$0xff] (!%p239_p13)  ;;  %v303_v28 = vld [vmem:[%s247_s4 + $0x50] sm:$0xff] (!%p239_p13) }
  0x2b   : > { %v306_v29 = vld [vmem:[%s247_s4 + $0x68] sm:$0xff] (!%p239_p13)  ;;  %v305_v30 = vld [vmem:[%s247_s4 + $0x60] sm:$0xff] (!%p239_p13)  ;;  %v308_v31 = vld [vmem:[%s247_s4 + $0x78] sm:$0xff] (!%p239_p13) }
  0x2c   : > { %326 = vperm.xlu1 %662, %v296_v19   ;;  %316 = vperm.xlu0 %661, %v294_v20   ;;  %v307_v32 = vld [vmem:[%s247_s4 + $0x70] sm:$0xff] }
  0x30   : > { %336 = vperm.xlu1 %662, %v298_v21   ;;  %331 = vperm.xlu0 %661, %v297_v22  }
  0x31   : > { %v664_v36 = vpop.eup %663 }
  0x32   : > { %v287_v38 = vadd.f32 1.0, %v664_v36  ;;  %v666_v41 = vpop.eup %665 }
  0x33   : > { %v288_v44 = vadd.f32 1.0, %v666_v41 }
  0x34   : > { %346 = vperm.xlu1 %662, %v300_v23   ;;  %341 = vperm.xlu0 %661, %v299_v24   ;;  %667 = vrcp.f32 %v287_v38 }
  0x35   : > { %669 = vrcp.f32 %v288_v44 }
  0x38   : > { %356 = vperm.xlu1 %662, %v302_v25   ;;  %351 = vperm.xlu0 %661, %v301_v26  }
  0x3c   : > { %366 = vperm.xlu1 %662, %v304_v27   ;;  %361 = vperm.xlu0 %661, %v303_v28  }
  0x3e   : > { %v668_v43 = vpop.eup %667 }
  0x3f   : > { %v394_v45 = vrot.slane %v668_v43, %v393_v42  ;;  %v670_v58 = vpop.eup %669 }
  0x40   : > { %376 = vperm.xlu1 %662, %v306_v29   ;;  %371 = vperm.xlu0 %661, %v305_v30   ;;  %v398_v63 = vrot.slane %v670_v58, %v393_v42 }
  0x44   : > { %386 = vperm.xlu1 %662, %v308_v31   ;;  %381 = vperm.xlu0 %661, %v307_v32  }
  0xa7   : > { %v322_v46 = vpop.permute.xlu1 %321  ;;  %v312_v47 = vpop.permute.xlu0 %311 }
  0xa8   : > { %v403_v48 = vmul.f32 %v394_v45, %v322_v46  ;;  %v401_v49 = vmul.f32 %v394_v45, %v312_v47 }
  0xaa   : > { %419 = vst [vmem:[%s840_s15 + $0x10] sm:$0xff] %v403_v48  ;;  %417 = vst [vmem:[%s840_s15] sm:$0xff] %v401_v49 }
  0xab   : > { %v327_v50 = vpop.permute.xlu1 %326  ;;  %v317_v51 = vpop.permute.xlu0 %316 }
  0xac   : > { %v404_v52 = vmul.f32 %v394_v45, %v327_v50  ;;  %v402_v53 = vmul.f32 %v394_v45, %v317_v51 }
  0xae   : > { %420 = vst [vmem:[%s840_s15 + $0x18] sm:$0xff] %v404_v52  ;;  %418 = vst [vmem:[%s840_s15 + $0x8] sm:$0xff] %v402_v53 }
  0xaf   : > { %v337_v54 = vpop.permute.xlu1 %336  ;;  %v332_v55 = vpop.permute.xlu0 %331 }
  0xb0   : > { %v406_v56 = vmul.f32 %v394_v45, %v337_v54  ;;  %v405_v57 = vmul.f32 %v394_v45, %v332_v55 }
  0xb2   : > { %422 = vst [vmem:[%s840_s15 + $0x28] sm:$0xff] %v406_v56  ;;  %421 = vst [vmem:[%s840_s15 + $0x20] sm:$0xff] %v405_v57 }
  0xb3   : > { %v347_v59 = vpop.permute.xlu1 %346  ;;  %v342_v60 = vpop.permute.xlu0 %341 }
  0xb4   : > { %v408_v61 = vmul.f32 %v394_v45, %v347_v59  ;;  %v407_v62 = vmul.f32 %v394_v45, %v342_v60 }
  0xb6   : > { %424 = vst [vmem:[%s840_s15 + $0x38] sm:$0xff] %v408_v61  ;;  %423 = vst [vmem:[%s840_s15 + $0x30] sm:$0xff] %v407_v62 }
  0xb7   : > { %v357_v0 = vpop.permute.xlu1 %356  ;;  %v352_v1 = vpop.permute.xlu0 %351 }
  0xb8   : > { %v410_v2 = vmul.f32 %v398_v63, %v357_v0  ;;  %v409_v3 = vmul.f32 %v398_v63, %v352_v1 }
  0xba   : > { %426 = vst [vmem:[%s840_s15 + $0x48] sm:$0xff] %v410_v2  ;;  %425 = vst [vmem:[%s840_s15 + $0x40] sm:$0xff] %v409_v3 }
  0xbb   : > { %v367_v4 = vpop.permute.xlu1 %366  ;;  %v362_v5 = vpop.permute.xlu0 %361 }
  0xbc   : > { %v412_v6 = vmul.f32 %v398_v63, %v367_v4  ;;  %v411_v7 = vmul.f32 %v398_v63, %v362_v5 }
  0xbe   : > { %428 = vst [vmem:[%s840_s15 + $0x58] sm:$0xff] %v412_v6  ;;  %427 = vst [vmem:[%s840_s15 + $0x50] sm:$0xff] %v411_v7 }
  0xbf   : > { %v377_v8 = vpop.permute.xlu1 %376  ;;  %v372_v9 = vpop.permute.xlu0 %371 }
  0xc0   : > { %v414_v10 = vmul.f32 %v398_v63, %v377_v8  ;;  %v413_v11 = vmul.f32 %v398_v63, %v372_v9 }
  0xc2   : > { %430 = vst [vmem:[%s840_s15 + $0x68] sm:$0xff] %v414_v10  ;;  %429 = vst [vmem:[%s840_s15 + $0x60] sm:$0xff] %v413_v11 }
  0xc3   : > { %v387_v12 = vpop.permute.xlu1 %386  ;;  %v382_v13 = vpop.permute.xlu0 %381 }
  0xc4   : > { %v416_v14 = vmul.f32 %v398_v63, %v387_v12  ;;  %v415_v15 = vmul.f32 %v398_v63, %v382_v13 }
  0xc6   : > { %432 = vst [vmem:[%s840_s15 + $0x78] sm:$0xff] %v416_v14  ;;  %431 = vst [vmem:[%s840_s15 + $0x70] sm:$0xff] %v415_v15 }
  0xc7   : > { %s592_s18 = sshll.u32 %s713_s12, 10  ;;  %s466_s20 = sshll.u32 %s840_s15, 4  ;;  %s467_s20 = int_to_ptr.vmem [resolvable:$true] %s466_s20 }
  0xc8   : > { %s449_s25 = scalar_lea.hbm %s904_s2, %s592_s18  ;;  %s724_s26 = smov 1024  }
  0xc9   : > { %593 = sst [smem:[#allocation6]] (%p784_p5), %s724_s26  ;;  %s725_s27 = smov 2048  }
  0xca   : > { %594 = sst [smem:[#allocation6 + $0x1]] (%p784_p5), %s725_s27  ;;  %s726_s28 = smov 8  }
  0xcb   : > { %595 = sst [smem:[#allocation6 + $0x2]] (%p784_p5), %s726_s28  ;;  %s727_s29 = smov 128  }
  0xcc   : > { %596 = sst [smem:[#allocation6 + $0x3]] (%p784_p5), %s727_s29  ;;  %s728_s12 = smov [#allocation5]  }
  0xcd   : > { %597 = sst [smem:[#allocation6 + $0x4]] (%p784_p5), %s727_s29  ;;  %s729_s30 = smov 0  }
  0xce   : > { %598 = sst [smem:[#allocation6 + $0x5]] (%p784_p5), %s726_s28 }
  0xcf   : > { %599 = dma.general (%p784_p5), %s467_s20, 2048, %s449_s25, %s434_s16, %s728_s12, [#allocation6], %s729_s30, 0  }
  0xd0 PF: > { %s494_s3 = sand.u32 1, %s701_s9   ;;  %p602_p0 = pnand %p577_p10, %p795_p9 }
  0xd1   : > { %s495_s4 = scalar_lea.sflag [#allocation4], %s494_s3 }
  0xd2   : > { %696 = dma.done.wait (!%p602_p0), %s495_s4, 2048  }
  0xd3   : > { %698 = vsyncadd (!%p602_p0), %s495_s4, 4294965248  ;;  %s15_s14 = sadd.s32 1, %s721_s14   ;;  %s907_s9 = smov %s705_s10 }
  0xd4   : > { %p12_p1 = scmp.ge.s32.totalorder %s15_s14, 4   ;;  %s908_s10 = smov %s709_s11 }
  0xd5   : > { %s909_s11 = smov %s793_s21  ;;  %s910_s12 = smov %s717_s13 }
  0xd6   : > { %s911_s13 = smov %s913_s17  ;;  %14 = sbr.rel (!%p12_p1) target bundleno = 4 (0x4), region = 114 }
  0xdd   :  { %500 = vsyncpa [#allocation4], 1 }
  0xde   :  { %502 = vsyncpa [#allocation4 + $0x1], 1 }

</bundles_post_ra>
